<compile_context>
chip_gen: v6e
topology: v6e:2x2x1
jax: 0.10.0
libtpu: 0.0.40
codegen_flags: <defaults>
</compile_context>

<pallas_src>
import functools

import jax
import jax.numpy as jnp
from jax.experimental import pallas as pl
from jax.experimental.pallas import tpu as pltpu


def _vmem_capacity_bytes():
    try:
        return int(pltpu.get_tpu_info().vmem_capacity_bytes)
    except Exception:
        return 64 * 1024 * 1024  # conservative (v7x-sized VMEM)


def _avg_kernel(x_ref, o_ref, acc_ref, *, inv_n, n_total, tn, mask_n, g, d_out):
    """Accumulate the sum over the reduced (sublane) axis; finalize with 1/N."""
    k = pl.program_id(2)
    last = pl.num_programs(2) - 1

    @pl.when(k == 0)
    def _init():
        acc_ref[...] = jnp.zeros_like(acc_ref)

    if mask_n:
        # Hot loop: plain sum on all full tiles ...
        @pl.when(k < last)
        def _full():
            acc_ref[...] += jnp.sum(x_ref[...].astype(jnp.float32), axis=1)

        # ... iota/cmp/select only on the single ragged tail tile.
        @pl.when(k == last)
        def _tail():
            x = x_ref[...].astype(jnp.float32)
            row = k * tn + jax.lax.broadcasted_iota(jnp.int32, x.shape, 1)
            acc_ref[...] += jnp.sum(jnp.where(row < n_total, x, 0.0), axis=1)
    else:
        acc_ref[...] += jnp.sum(x_ref[...].astype(jnp.float32), axis=1)

    @pl.when(k == last)
    def _finalize():
        acc = acc_ref[...]
        if g > 1:
            # Finish the lane-fold: sum the g interleaved feature chunks.
            tot = acc[:, 0:d_out]
            for i in range(1, g):
                tot = tot + acc[:, i * d_out:(i + 1) * d_out]
        else:
            tot = acc
        # Divide by the FULL (original) N, not the tile size.
        o_ref[...] = (tot * inv_n).astype(o_ref.dtype)


def _choose_tiles(B, N, D, itemsize, vmem_cap):
    """Pick (TB, TN, TD) respecting TPU (8, 128) block constraints.

    Each of the last-two block dims is either a multiple of its alignment or
    equal to the full array dim. Partial edge blocks are safe: out-of-range
    B/D reads only feed output rows/lanes whose writes Pallas drops, and
    out-of-range reduction rows are masked in the kernel's tail step.
    """
    # dtype-aware sublane multiple (f32: 8, bf16: 16, int8/fp8: 32).
    sub = max(8, 32 // max(1, itemsize))

    # Lane (feature) tile: prefer the full feature extent (contiguous HBM
    # rows, feature grid axis collapses); fall back to 128-multiples.
    if D <= 2048:
        TD = D
    else:
        TD = 2048

    # Per-input-block byte budget: ~VMEM/4, capped at 16 MiB (two of these
    # buffers stream concurrently; v7x has 64 MiB physical VMEM).
    budget = max(4 << 20, min(16 << 20, vmem_cap // 4))
    budget_rows = max(sub, budget // max(1, TD * itemsize))

    # Batch tile: sublane multiple for dense output stores when B allows.
    TB = sub if B >= sub else B

    # Reduction tile: sublane multiple (or full N), within the row budget.
    TN = min(N, max(sub, ((budget_rows // TB) // sub) * sub))

    # If the whole reduction fits in one tile, spend leftover rows on batch.
    if TN == N and B > TB:
        grow = budget_rows // max(1, N)
        if grow >= 2 * sub:
            TB = min(B, (grow // sub) * sub)  # multiple of sub or == B

    return TB, TN, TD


def _mean_dim_neg2(x, tiles=None):
    """Mean over dim=-2 of a 3D array [B, N, D] via a Pallas TPU kernel."""
    assert x.ndim == 3, "kernel path expects a 3D [B, N, D] tensor"
    B, N, D = x.shape
    itemsize = jnp.dtype(x.dtype).itemsize
    out_dtype = x.dtype if jnp.issubdtype(x.dtype, jnp.floating) else jnp.float32

    # Lane folding for small D: [B, N, D] -> [B, N/g, g*D] (contiguous
    # reshape) so loads/stores are lane-dense. Only fold when g divides N.
    g = 1
    if D < 128 and N > 1:
        g_max = min(N, -(-128 // D))  # ceil(128 / D)
        for cand in range(g_max, 1, -1):
            if N % cand == 0:
                g = cand
                break
    Nk, Dk = N // g, D * g
    xk = x if g == 1 else x.reshape(B, Nk, Dk)

    vmem_cap = _vmem_capacity_bytes()
    if tiles is not None:
        TB, TN, TD = tiles
    else:
        TB, TN, TD = _choose_tiles(B, Nk, Dk, itemsize, vmem_cap)
        # v7x has 2 TensorCores: give both work when the problem is big
        # enough to amortize the extra grid steps. (1-TC chips have >64 MiB
        # VMEM, so this branch never fires there.)
        if vmem_cap <= (64 << 20):
            total_bytes = B * Nk * Dk * itemsize
            if total_bytes >= (4 << 20) and pl.cdiv(B, TB) * pl.cdiv(Dk, TD) == 1:
                sub = max(8, 32 // max(1, itemsize))
                if B > sub:
                    TB = max(sub, (((B + 1) // 2 + sub - 1) // sub) * sub)
                elif g == 1 and TD >= 256:
                    TD = max(128, ((TD // 2) // 128) * 128)

    out_td = D if g > 1 else TD
    grid = (pl.cdiv(B, TB), pl.cdiv(Dk, TD), pl.cdiv(Nk, TN))

    kernel = functools.partial(
        _avg_kernel,
        inv_n=1.0 / N,
        n_total=Nk,
        tn=TN,
        mask_n=(Nk % TN != 0),
        g=g,
        d_out=D,
    )

    out_itemsize = jnp.dtype(out_dtype).itemsize
    in_block = TB * TN * TD * itemsize
    out_block = TB * out_td * out_itemsize
    acc_bytes = TB * TD * 4
    needed = 2 * in_block + 2 * out_block + acc_bytes + (2 << 20)
    vmem_limit = int(min(max(needed, 32 << 20), (vmem_cap * 3) // 4))

    cost = pl.CostEstimate(
        flops=B * Nk * Dk,
        transcendentals=0,
        bytes_accessed=B * Nk * Dk * itemsize + B * D * out_itemsize,
    )

    return pl.pallas_call(
        kernel,
        out_shape=jax.ShapeDtypeStruct((B, D), out_dtype),
        grid_spec=pltpu.PrefetchScalarGridSpec(
            num_scalar_prefetch=0,
            grid=grid,
            in_specs=[pl.BlockSpec((TB, TN, TD), lambda b, d, k: (b, k, d))],
            out_specs=pl.BlockSpec((TB, out_td), lambda b, d, k: (b, d)),
            scratch_shapes=[pltpu.VMEM((TB, TD), jnp.float32)],
        ),
        compiler_params=pltpu.CompilerParams(
            dimension_semantics=("parallel", "parallel", "arbitrary"),
            vmem_limit_bytes=vmem_limit,
        ),
        cost_estimate=cost,
    )(xk)


def avg_forward(*args, dim=-2):
    """Faithful port of Avg.forward (Pallas kernel on the default dim=-2 path)."""
    assert len(args) > 0, "Expected at least one input tensor"
    x = args[-1]
    shape = list(x.shape)
    d = dim if dim >= 0 else dim + len(shape)

    if len(shape) >= 2 and d == len(shape) - 2:
        lead = shape[:d]
        N, D = shape[d], shape[d + 1]
        itemsize = jnp.dtype(x.dtype).itemsize
        if x.size * itemsize < (1 << 20):
            # Tiny inputs (the module's typical shapes): pallas_call fixed cost
            # dominates and XLA fuses this mean anyway.
            m = jnp.mean(x, axis=d)
        else:
            x3 = x if len(lead) == 1 else x.reshape((-1, N, D))
            m = _mean_dim_neg2(x3).reshape(tuple(lead) + (D,))
    else:
        # Non-default reduction axis: plain reduction (not the module's hot path).
        m = jnp.mean(x, axis=d)

    if len(args) > 1:
        return args[:-1] + (m,)
    return m


if __name__ == "__main__":
    key = jax.random.PRNGKey(0)
    k1, k2, k3, k4, k5, k6 = jax.random.split(key, 6)

    # Test 1: module-default small shape (batch=2, seq N=8, hidden D=32).
    x = jax.random.normal(k1, (2, 8, 32), dtype=jnp.float32)
    extra = jax.random.normal(k2, (2, 4), dtype=jnp.float32)  # pass-through arg

    out = jax.block_until_ready(avg_forward(x))
    ref = jnp.mean(x, axis=-2)
    assert out.shape == ref.shape and out.dtype == ref.dtype
    assert jnp.allclose(out, ref, atol=1e-5, rtol=1e-5)

    # Multi-arg path (pass-through semantics).
    outs = jax.block_until_ready(avg_forward(extra, x))
    assert len(outs) == 2
    assert jnp.array_equal(outs[0], extra)
    assert jnp.allclose(outs[1], ref, atol=1e-5, rtol=1e-5)

    # Test 2: direct kernel, full-D feature tile path (D multiple of 128).
    a = jax.random.normal(k3, (8, 48, 256), dtype=jnp.float32)
    out_a = jax.block_until_ready(_mean_dim_neg2(a))
    assert jnp.allclose(out_a, jnp.mean(a, axis=-2), atol=1e-5, rtol=1e-5)

    # Test 3: force multi-block tiling (partial B and D edge blocks, gated
    # masked-N tail, resident accumulator across the reduction axis).
    b = jax.random.normal(k4, (12, 20, 200), dtype=jnp.float32)
    out_b = jax.block_until_ready(_mean_dim_neg2(b, tiles=(8, 8, 128)))
    assert jnp.allclose(out_b, jnp.mean(b, axis=-2), atol=1e-5, rtol=1e-5)

    # Test 4: small-D lane-folding path (D=32 -> g=4, folded lanes = 128).
    c = jax.random.normal(k5, (8, 40, 32), dtype=jnp.float32)
    out_c = jax.block_until_ready(_mean_dim_neg2(c))
    assert jnp.allclose(out_c, jnp.mean(c, axis=-2), atol=1e-5, rtol=1e-5)

    # Test 5: bf16 input (dtype-aware sublane tiling, f32 accumulation).
    e = jax.random.normal(k6, (16, 33, 256), dtype=jnp.bfloat16)
    out_e = jax.block_until_ready(_mean_dim_neg2(e))
    ref_e = jnp.mean(e.astype(jnp.float32), axis=-2).astype(jnp.bfloat16)
    assert out_e.dtype == jnp.bfloat16
    assert jnp.allclose(out_e.astype(jnp.float32), ref_e.astype(jnp.float32),
                        atol=2e-2, rtol=2e-2)

    print("KERNEL_OK")
</pallas_src>

<mosaic_0001>
module attributes {stable_mosaic.version = 11 : i64} {
  func.func @_avg_kernel(%arg0: i32, %arg1: i32, %arg2: i32, %arg3: memref<8x48x256xf32, #tpu.memory_space<vmem>>, %arg4: memref<8x256xf32, #tpu.memory_space<vmem>>, %arg5: memref<8x256xf32, #tpu.memory_space<vmem>>) attributes {dimension_semantics = [#tpu.dimension_semantics<parallel>, #tpu.dimension_semantics<parallel>, #tpu.dimension_semantics<arbitrary>], iteration_bounds = array<i64: 1, 1, 1>, scalar_prefetch = 0 : i64, scratch_operands = 1 : i64, tpu.core_type = #tpu.core_type<tc>, window_params = [{transform_indices = @transform_0, window_bounds = array<i64: 8, 48, 256>}, {transform_indices = @transform_1, window_bounds = array<i64: 8, 256>}]} {
    %c0_i32 = arith.constant 0 : i32
    %0 = arith.cmpi eq, %arg2, %c0_i32 : i32
    %1 = arith.extui %0 : i1 to i32
    %c0_i32_0 = arith.constant 0 : i32
    %2 = arith.cmpi ne, %1, %c0_i32_0 : i32
    scf.if %2 {
      %cst_9 = arith.constant 0.000000e+00 : f32
      %11 = vector.broadcast %cst_9 : f32 to vector<8x256xf32>
      %c0_10 = arith.constant 0 : index
      %c0_11 = arith.constant 0 : index
      %12 = vector.load %arg5[%c0_10, %c0_11] : memref<8x256xf32, #tpu.memory_space<vmem>>, vector<8x256xf32>
      tpu.vector_store %arg5[%c0_10, %c0_11], %11 {strides = array<i32>} : memref<8x256xf32, #tpu.memory_space<vmem>>, vector<8x256xf32>,
    } else {
    }
    %c0 = arith.constant 0 : index
    %c0_1 = arith.constant 0 : index
    %3 = vector.load %arg5[%c0, %c0_1] : memref<8x256xf32, #tpu.memory_space<vmem>>, vector<8x256xf32>
    %c0_2 = arith.constant 0 : index
    %c0_3 = arith.constant 0 : index
    %c0_4 = arith.constant 0 : index
    %4 = vector.load %arg3[%c0_2, %c0_3, %c0_4] : memref<8x48x256xf32, #tpu.memory_space<vmem>>, vector<8x48x256xf32>
    %cst = arith.constant dense<0.000000e+00> : vector<8x256xf32>
    %5 = vector.multi_reduction <add>, %4, %cst [1] : vector<8x48x256xf32> to vector<8x256xf32>
    %6 = arith.addf %3, %5 : vector<8x256xf32>
    %c0_5 = arith.constant 0 : index
    %c0_6 = arith.constant 0 : index
    %7 = vector.load %arg5[%c0_5, %c0_6] : memref<8x256xf32, #tpu.memory_space<vmem>>, vector<8x256xf32>
    tpu.vector_store %arg5[%c0_5, %c0_6], %6 {strides = array<i32>} : memref<8x256xf32, #tpu.memory_space<vmem>>, vector<8x256xf32>,
    %c0_i32_7 = arith.constant 0 : i32
    %8 = arith.cmpi eq, %arg2, %c0_i32_7 : i32
    %9 = arith.extui %8 : i1 to i32
    %c0_i32_8 = arith.constant 0 : i32
    %10 = arith.cmpi ne, %9, %c0_i32_8 : i32
    scf.if %10 {
      %c0_9 = arith.constant 0 : index
      %c0_10 = arith.constant 0 : index
      %11 = vector.load %arg5[%c0_9, %c0_10] : memref<8x256xf32, #tpu.memory_space<vmem>>, vector<8x256xf32>
      %cst_11 = arith.constant 0.020833334 : f32
      %12 = vector.broadcast %cst_11 : f32 to vector<8x256xf32>
      %13 = arith.mulf %11, %12 : vector<8x256xf32>
      %c0_12 = arith.constant 0 : index
      %c0_13 = arith.constant 0 : index
      %14 = vector.load %arg4[%c0_12, %c0_13] : memref<8x256xf32, #tpu.memory_space<vmem>>, vector<8x256xf32>
      tpu.vector_store %arg4[%c0_12, %c0_13], %13 {strides = array<i32>} : memref<8x256xf32, #tpu.memory_space<vmem>>, vector<8x256xf32>,
    } else {
    }
    return
  }
  func.func @transform_0(%arg0: i32, %arg1: i32, %arg2: i32) -> (i32, i32, i32) {
    %c0_i32 = arith.constant 0 : i32
    return %arg0, %arg2, %arg1 : i32, i32, i32
  }
  func.func @transform_1(%arg0: i32, %arg1: i32, %arg2: i32) -> (i32, i32) {
    %c0_i32 = arith.constant 0 : i32
    return %arg0, %arg1 : i32, i32
  }
}

</mosaic_0001>

<bundles_post_ra>
// kernel: tpu_custom_call.1
= control target key start
LH: loop header
LB: loop body
LE: loop exit
PB: predicated region body
PF: predicated region fallthrough
CT: control target
= control target key end

     0   :  { %6 = vsyncpa [#allocation4], 0  ;;  %s473_s0 = inlined_call_operand.hbm [shape: f32[8,48,256], index: 0, kind: input, shape index: {}]   ;;  %s474_s1 = inlined_call_operand.hbm [shape: f32[8,256], index: 1, kind: output, shape index: {}]  }
   0x1   :  { %7 = vsyncpa [#allocation5], 0  ;;  %s418_s6 = smov [#allocation3]  }
   0x2   :  { %s13_s7 = sshll.u32 %s418_s6, 4  ;;  %s14_s7 = int_to_ptr.vmem [resolvable:$true] %s13_s7 }
   0x3   :  { %s382_s8 = scalar_lea.vmem %s14_s7, 12288  ;;  %p387_p1 = scmp.lt.s32.totalorder %s14_s7, %s14_s7 }
   0x4   :  { %p383_p0 = scmp.ne.s32.totalorder %s14_s7, %s382_s8  ;;  %p388_p2 = scmp.lt.s32.totalorder %s382_s8, %s382_s8 }
   0x6   :  { %p389_p3 = por %p388_p2, %p387_p1 }
   0x8   :  { %p390_p4 = pnand %p389_p3, %p383_p0 }
   0xa   :  { %393 = shalt.err (!%p390_p4)
}
   0xb   :  { %s419_s9 = smov 256   ;;  %s420_s10 = smov 16  }
   0xc   :  { %19 = dma.hbm_to_vmem [thread:$0]  %s473_s0, 12288, %s14_s7, [#allocation4], %s419_s9, %s419_s9, %s420_s10  }
   0xd   :  { %414 = dma.done.wait [#allocation4], 12288  }
   0xe   :  { %415 = vsyncadd [#allocation4], 4294955008  ;;  %v31_v0 = vld [vmem:[#allocation3] sm:$0xff]  ;;  %v32_v1 = vld [vmem:[#allocation3 + $0x8] sm:$0xff]  ;;  %vm319_vm0 = vcmask 1041409   ;;  %vm321_vm1 = vcmask 1042434  }
   0xf   :  { %v33_v2 = vld [vmem:[#allocation3 + $0x10] sm:$0xff]  ;;  %v34_v3 = vld [vmem:[#allocation3 + $0x18] sm:$0xff]  ;;  %v35_v4 = vld [vmem:[#allocation3 + $0x20] sm:$0xff]  ;;  %vm323_vm2 = vcmask 1043459   ;;  %vm325_vm3 = vcmask 1044484   ;;  %vm327_vm4 = vcmask 1045509  }
  0x10   :  { %v36_v5 = vld [vmem:[#allocation3 + $0x28] sm:$0xff]  ;;  %v127_v6 = vadd.f32 %v33_v2, %v31_v0  ;;  %v37_v7 = vld [vmem:[#allocation3 + $0x30] sm:$0xff]  ;;  %v138_v8 = vadd.f32 %v34_v3, %v32_v1  ;;  %v38_v9 = vld [vmem:[#allocation3 + $0x38] sm:$0xff]  ;;  %vm329_vm5 = vcmask 1046534   ;;  %vm331_vm6 = vcmask 1047559   ;;  %s421_s0 = smov [#allocation6]  }
  0x11   :  { %v39_v10 = vld [vmem:[#allocation3 + $0x40] sm:$0xff]  ;;  %v40_v11 = vld [vmem:[#allocation3 + $0x48] sm:$0xff]  ;;  %v45_v15 = vld [vmem:[#allocation3 + $0x70] sm:$0xff]  ;;  %s361_s13 = sshll.u32 %s421_s0, 4  ;;  %s362_s13 = int_to_ptr.vmem [resolvable:$true] %s361_s13 }
  0x12   :  { %v128_v12 = vadd.f32 %v127_v6, %v35_v4  ;;  %v43_v13 = vld [vmem:[#allocation3 + $0x60] sm:$0xff]  ;;  %v44_v14 = vld [vmem:[#allocation3 + $0x68] sm:$0xff]  ;;  %v139_v16 = vadd.f32 %v138_v8, %v36_v5  ;;  %v46_v17 = vld [vmem:[#allocation3 + $0x78] sm:$0xff]  ;;  %s394_s14 = scalar_lea.vmem %s362_s13, 256  ;;  %p399_p6 = scmp.lt.s32.totalorder %s362_s13, %s362_s13 }
  0x13   :  { %v47_v18 = vld [vmem:[#allocation3 + $0x80] sm:$0xff]  ;;  %v48_v19 = vld [vmem:[#allocation3 + $0x88] sm:$0xff]  ;;  %v149_v21 = vadd.f32 %v45_v15, %v43_v13  ;;  %v41_v22 = vld [vmem:[#allocation3 + $0x50] sm:$0xff]  ;;  %v160_v26 = vadd.f32 %v46_v17, %v44_v14  ;;  %p395_p5 = scmp.ne.s32.totalorder %s362_s13, %s394_s14  ;;  %p400_p7 = scmp.lt.s32.totalorder %s394_s14, %s394_s14 }
  0x14   :  { %v129_v20 = vadd.f32 %v128_v12, %v37_v7  ;;  %v42_v23 = vld [vmem:[#allocation3 + $0x58] sm:$0xff]  ;;  %v49_v24 = vld [vmem:[#allocation3 + $0x90] sm:$0xff]  ;;  %v140_v25 = vadd.f32 %v139_v16, %v38_v9  ;;  %v51_v28 = vld [vmem:[#allocation3 + $0xa0] sm:$0xff] }
  0x15   :  { %v50_v27 = vld [vmem:[#allocation3 + $0x98] sm:$0xff]  ;;  %v52_v29 = vld [vmem:[#allocation3 + $0xa8] sm:$0xff]  ;;  %v150_v31 = vadd.f32 %v149_v21, %v47_v18  ;;  %v55_v32 = vld [vmem:[#allocation3 + $0xc0] sm:$0xff]  ;;  %v161_v36 = vadd.f32 %v160_v26, %v48_v19  ;;  %p401_p8 = por %p400_p7, %p399_p6 }
  0x16   :  { %v130_v30 = vadd.f32 %v129_v20, %v39_v10  ;;  %v56_v33 = vld [vmem:[#allocation3 + $0xc8] sm:$0xff]  ;;  %v57_v34 = vld [vmem:[#allocation3 + $0xd0] sm:$0xff]  ;;  %v141_v35 = vadd.f32 %v140_v25, %v40_v11  ;;  %v58_v37 = vld [vmem:[#allocation3 + $0xd8] sm:$0xff] }
  0x17   :  { %v59_v38 = vld [vmem:[#allocation3 + $0xe0] sm:$0xff]  ;;  %v60_v39 = vld [vmem:[#allocation3 + $0xe8] sm:$0xff]  ;;  %v151_v41 = vadd.f32 %v150_v31, %v49_v24  ;;  %v171_v42 = vadd.f32 %v57_v34, %v55_v32  ;;  %v53_v43 = vld [vmem:[#allocation3 + $0xb0] sm:$0xff]  ;;  %v162_v47 = vadd.f32 %v161_v36, %v50_v27  ;;  %v182_v48 = vadd.f32 %v58_v37, %v56_v33  ;;  %p402_p9 = pnand %p401_p8, %p395_p5 }
  0x18   :  { %v131_v40 = vadd.f32 %v130_v30, %v41_v22  ;;  %v54_v44 = vld [vmem:[#allocation3 + $0xb8] sm:$0xff]  ;;  %v61_v45 = vld [vmem:[#allocation3 + $0xf0] sm:$0xff]  ;;  %v142_v46 = vadd.f32 %v141_v35, %v42_v23  ;;  %v63_v50 = vld [vmem:[#allocation3 + $0x100] sm:$0xff] }
  0x19   :  { %v62_v49 = vld [vmem:[#allocation3 + $0xf8] sm:$0xff]  ;;  %v64_v51 = vld [vmem:[#allocation3 + $0x108] sm:$0xff]  ;;  %v152_v53 = vadd.f32 %v151_v41, %v51_v28  ;;  %v172_v54 = vadd.f32 %v171_v42, %v59_v38  ;;  %v67_v55 = vld [vmem:[#allocation3 + $0x120] sm:$0xff]  ;;  %v163_v59 = vadd.f32 %v162_v47, %v52_v29  ;;  %v183_v60 = vadd.f32 %v182_v48, %v60_v39 }
  0x1a   :  { %v132_v52 = vrot.slane %v131_v40, 4  ;;  %v68_v56 = vld [vmem:[#allocation3 + $0x128] sm:$0xff]  ;;  %v69_v57 = vld [vmem:[#allocation3 + $0x130] sm:$0xff]  ;;  %v143_v58 = vrot.slane %v142_v46, 4  ;;  %v70_v61 = vld [vmem:[#allocation3 + $0x138] sm:$0xff] }
  0x1b   :  { %v71_v62 = vld [vmem:[#allocation3 + $0x140] sm:$0xff]  ;;  %v72_v63 = vld [vmem:[#allocation3 + $0x148] sm:$0xff]  ;;  %v153_v1 = vadd.f32 %v152_v53, %v53_v43  ;;  %v173_v2 = vadd.f32 %v172_v54, %v61_v45  ;;  %v193_v3 = vadd.f32 %v69_v57, %v67_v55  ;;  %v65_v4 = vld [vmem:[#allocation3 + $0x110] sm:$0xff]  ;;  %v164_v7 = vadd.f32 %v163_v59, %v54_v44 }
  0x1c   :  { %v133_v0 = vadd.f32 %v132_v52, %v131_v40  ;;  %v73_v5 = vld [vmem:[#allocation3 + $0x150] sm:$0xff]  ;;  %v144_v6 = vadd.f32 %v143_v58, %v142_v46  ;;  %v184_v8 = vadd.f32 %v183_v60, %v62_v49  ;;  %v204_v9 = vadd.f32 %v70_v61, %v68_v56  ;;  %v66_v10 = vld [vmem:[#allocation3 + $0x118] sm:$0xff]  ;;  %v75_v16 = vld [vmem:[#allocation3 + $0x160] sm:$0xff] }
  0x1d   :  { %v74_v11 = vld [vmem:[#allocation3 + $0x158] sm:$0xff]  ;;  %v154_v13 = vrot.slane %v153_v1, 4  ;;  %v174_v14 = vadd.f32 %v173_v2, %v63_v50  ;;  %v194_v15 = vadd.f32 %v193_v3, %v71_v62  ;;  %v165_v18 = vrot.slane %v164_v7, 4  ;;  %v76_v21 = vld [vmem:[#allocation3 + $0x168] sm:$0xff]  ;;  %v77_v26 = vld [vmem:[#allocation3 + $0x170] sm:$0xff] }
  0x1e   :  { %v134_v12 = vrot.slane %v133_v0, 2  ;;  %v145_v17 = vrot.slane %v144_v6, 2  ;;  %v185_v19 = vadd.f32 %v184_v8, %v64_v51  ;;  %v205_v20 = vadd.f32 %v204_v9, %v72_v63  ;;  %v78_v31 = vld [vmem:[#allocation3 + $0x178] sm:$0xff]  ;;  %v79_v36 = vld [vmem:[#allocation3 + $0x180] sm:$0xff]  ;;  %v81_v37 = vld [vmem:[#allocation3 + $0x190] sm:$0xff] }
  0x1f   :  { %v155_v23 = vadd.f32 %v154_v13, %v153_v1  ;;  %v175_v24 = vadd.f32 %v174_v14, %v65_v4  ;;  %v195_v25 = vadd.f32 %v194_v15, %v73_v5  ;;  %v166_v28 = vadd.f32 %v165_v18, %v164_v7  ;;  %v80_v42 = vld [vmem:[#allocation3 + $0x188] sm:$0xff]  ;;  %v82_v43 = vld [vmem:[#allocation3 + $0x198] sm:$0xff]  ;;  %v83_v47 = vld [vmem:[#allocation3 + $0x1a0] sm:$0xff] }
  0x20   :  { %v135_v22 = vadd.f32 %v134_v12, %v133_v0  ;;  %v146_v27 = vadd.f32 %v145_v17, %v144_v6  ;;  %v186_v29 = vadd.f32 %v185_v19, %v66_v10  ;;  %v206_v30 = vadd.f32 %v205_v20, %v74_v11  ;;  %v84_v52 = vld [vmem:[#allocation3 + $0x1a8] sm:$0xff]  ;;  %v85_v57 = vld [vmem:[#allocation3 + $0x1b0] sm:$0xff]  ;;  %v91_v58 = vld [vmem:[#allocation3 + $0x1e0] sm:$0xff] }
  0x21   :  { %v156_v33 = vrot.slane %v155_v23, 2  ;;  %v176_v34 = vrot.slane %v175_v24, 4  ;;  %v196_v35 = vadd.f32 %v195_v25, %v75_v16  ;;  %v167_v39 = vrot.slane %v166_v28, 2  ;;  %v93_v59 = vld [vmem:[#allocation3 + $0x1f0] sm:$0xff]  ;;  %v86_v0 = vld [vmem:[#allocation3 + $0x1b8] sm:$0xff]  ;;  %v92_v1 = vld [vmem:[#allocation3 + $0x1e8] sm:$0xff] }
  0x22   :  { %v136_v32 = vrot.slane %v135_v22, 1  ;;  %v147_v38 = vrot.slane %v146_v27, 1  ;;  %v187_v40 = vrot.slane %v186_v29, 4  ;;  %v207_v41 = vadd.f32 %v206_v30, %v76_v21  ;;  %v94_v2 = vld [vmem:[#allocation3 + $0x1f8] sm:$0xff]  ;;  %v87_v7 = vld [vmem:[#allocation3 + $0x1c0] sm:$0xff]  ;;  %v88_v8 = vld [vmem:[#allocation3 + $0x1c8] sm:$0xff] }
  0x23   :  { %v157_v44 = vadd.f32 %v156_v33, %v155_v23  ;;  %v177_v45 = vadd.f32 %v176_v34, %v175_v24  ;;  %v197_v46 = vadd.f32 %v196_v35, %v77_v26  ;;  %v168_v49 = vadd.f32 %v167_v39, %v166_v28  ;;  %v95_v9 = vld [vmem:[#allocation3 + $0x200] sm:$0xff]  ;;  %v89_v14 = vld [vmem:[#allocation3 + $0x1d0] sm:$0xff]  ;;  %v90_v15 = vld [vmem:[#allocation3 + $0x1d8] sm:$0xff] }
  0x24   :  { %v435_v48 = vadd.f32 %v136_v32, %v135_v22  ;;  %v188_v50 = vadd.f32 %v187_v40, %v186_v29  ;;  %v208_v51 = vadd.f32 %v207_v41, %v78_v31  ;;  %v215_v56 = vadd.f32 %v81_v37, %v79_v36  ;;  %v96_v16 = vld [vmem:[#allocation3 + $0x208] sm:$0xff]  ;;  %v97_v21 = vld [vmem:[#allocation3 + $0x210] sm:$0xff]  ;;  %v103_v22 = vld [vmem:[#allocation3 + $0x240] sm:$0xff] }
  0x25   :  { %v158_v53 = vrot.slane %v157_v44, 1  ;;  %v178_v54 = vrot.slane %v177_v45, 2  ;;  %v198_v55 = vrot.slane %v197_v46, 4  ;;  %v437_v60 = vadd.f32 %v147_v38, %v146_v27  ;;  %v105_v23 = vld [vmem:[#allocation3 + $0x250] sm:$0xff]  ;;  %v98_v28 = vld [vmem:[#allocation3 + $0x218] sm:$0xff]  ;;  %v104_v29 = vld [vmem:[#allocation3 + $0x248] sm:$0xff] }
  0x26   :  { %v189_v61 = vrot.slane %v188_v50, 2  ;;  %v209_v62 = vrot.slane %v208_v51, 4  ;;  %v226_v63 = vadd.f32 %v82_v43, %v80_v42  ;;  %v169_v3 = vrot.slane %v168_v49, 1  ;;  %v106_v30 = vld [vmem:[#allocation3 + $0x258] sm:$0xff]  ;;  %v99_v35 = vld [vmem:[#allocation3 + $0x220] sm:$0xff]  ;;  %v100_v36 = vld [vmem:[#allocation3 + $0x228] sm:$0xff] }
  0x27   :  { %v179_v4 = vadd.f32 %v178_v54, %v177_v45  ;;  %v199_v5 = vadd.f32 %v198_v55, %v197_v46  ;;  %v216_v6 = vadd.f32 %v215_v56, %v83_v47  ;;  %v439_v10 = vadd.f32 %v158_v53, %v157_v44  ;;  %v107_v37 = vld [vmem:[#allocation3 + $0x260] sm:$0xff]  ;;  %v101_v42 = vld [vmem:[#allocation3 + $0x230] sm:$0xff]  ;;  %v102_v43 = vld [vmem:[#allocation3 + $0x238] sm:$0xff] }
  0x28   :  { %v190_v11 = vadd.f32 %v189_v61, %v188_v50  ;;  %v210_v12 = vadd.f32 %v209_v62, %v208_v51  ;;  %v227_v13 = vadd.f32 %v226_v63, %v84_v52  ;;  %v237_v20 = vadd.f32 %v93_v59, %v91_v58  ;;  %v108_v44 = vld [vmem:[#allocation3 + $0x268] sm:$0xff]  ;;  %v109_v50 = vld [vmem:[#allocation3 + $0x270] sm:$0xff]  ;;  %v115_v51 = vld [vmem:[#allocation3 + $0x2a0] sm:$0xff] }
  0x29   :  { %v180_v17 = vrot.slane %v179_v4, 1  ;;  %v200_v18 = vrot.slane %v199_v5, 2  ;;  %v217_v19 = vadd.f32 %v216_v6, %v85_v57  ;;  %v248_v27 = vadd.f32 %v94_v2, %v92_v1  ;;  %v117_v52 = vld [vmem:[#allocation3 + $0x2b0] sm:$0xff]  ;;  %v110_v57 = vld [vmem:[#allocation3 + $0x278] sm:$0xff]  ;;  %v116_v58 = vld [vmem:[#allocation3 + $0x2a8] sm:$0xff] }
  0x2a   :  { %v191_v24 = vrot.slane %v190_v11, 1  ;;  %v211_v25 = vrot.slane %v210_v12, 2  ;;  %v228_v26 = vadd.f32 %v227_v13, %v86_v0  ;;  %v441_v31 = vadd.f32 %v169_v3, %v168_v49  ;;  %v118_v59 = vld [vmem:[#allocation3 + $0x2b8] sm:$0xff]  ;;  %v111_v1 = vld [vmem:[#allocation3 + $0x280] sm:$0xff] }
  0x2b   :  { %v201_v32 = vadd.f32 %v200_v18, %v199_v5  ;;  %v218_v33 = vadd.f32 %v217_v19, %v87_v7  ;;  %v238_v34 = vadd.f32 %v237_v20, %v95_v9  ;;  %v443_v38 = vadd.f32 %v180_v17, %v179_v4  ;;  %v119_v2 = vld [vmem:[#allocation3 + $0x2c0] sm:$0xff]  ;;  %v112_v7 = vld [vmem:[#allocation3 + $0x288] sm:$0xff]  ;;  %v114_v20 = vld [vmem:[#allocation3 + $0x298] sm:$0xff] }
  0x2c   :  { %v445_v39 = vadd.f32 %v211_v25, %v210_v12  ;;  %v229_v40 = vadd.f32 %v228_v26, %v88_v8  ;;  %v249_v41 = vadd.f32 %v248_v27, %v96_v16  ;;  %v259_v49 = vadd.f32 %v105_v23, %v103_v22  ;;  %v120_v8 = vld [vmem:[#allocation3 + $0x2c8] sm:$0xff]  ;;  %v123_v26 = vld [vmem:[#allocation3 + $0x2e0] sm:$0xff] }
  0x2d   :  { %v202_v45 = vrot.slane %v201_v32, 1  ;;  %v219_v46 = vadd.f32 %v218_v33, %v89_v14  ;;  %v239_v47 = vadd.f32 %v238_v34, %v97_v21  ;;  %v447_v53 = vadd.f32 %v191_v24, %v190_v11  ;;  %v113_v14 = vld [vmem:[#allocation3 + $0x290] sm:$0xff]  ;;  %v122_v21 = vld [vmem:[#allocation3 + $0x2d8] sm:$0xff] }
  0x2e   :  { %v230_v54 = vadd.f32 %v229_v40, %v90_v15  ;;  %v250_v55 = vadd.f32 %v249_v41, %v98_v28  ;;  %v270_v56 = vadd.f32 %v106_v30, %v104_v29  ;;  %v213_v61 = vrot.slane %v445_v39, 1  ;;  %v121_v15 = vld [vmem:[#allocation3 + $0x2d0] sm:$0xff] }
  0x2f   :  { %v220_v62 = vrot.slane %v219_v46, 4  ;;  %v240_v63 = vadd.f32 %v239_v47, %v99_v35  ;;  %v260_v0 = vadd.f32 %v259_v49, %v107_v37  ;;  %v450_v3 = vadd.f32 %v202_v45, %v201_v32  ;;  %v124_v32 = vld [vmem:[#allocation3 + $0x2e8] sm:$0xff]  ;;  %v125_v37 = vld [vmem:[#allocation3 + $0x2f0] sm:$0xff] }
  0x30   :  { %v231_v4 = vrot.slane %v230_v54, 4  ;;  %v251_v5 = vadd.f32 %v250_v55, %v100_v36  ;;  %v271_v6 = vadd.f32 %v270_v56, %v108_v44  ;;  %v281_v13 = vadd.f32 %v117_v52, %v115_v51  ;;  %v126_v44 = vld [vmem:[#allocation3 + $0x2f8] sm:$0xff] }
  0x31   :  { %v221_v9 = vadd.f32 %v220_v62, %v219_v46  ;;  %v241_v11 = vadd.f32 %v240_v63, %v101_v42  ;;  %v261_v12 = vadd.f32 %v260_v0, %v109_v50  ;;  %v292_v19 = vadd.f32 %v118_v59, %v116_v58 }
  0x32   :  { %v232_v16 = vadd.f32 %v231_v4, %v230_v54  ;;  %v252_v17 = vadd.f32 %v251_v5, %v102_v43  ;;  %v272_v18 = vadd.f32 %v271_v6, %v110_v57  ;;  %v282_v25 = vadd.f32 %v281_v13, %v119_v2 }
  0x33   :  { %v222_v22 = vrot.slane %v221_v9, 2  ;;  %v242_v23 = vrot.slane %v241_v11, 4  ;;  %v262_v24 = vadd.f32 %v261_v12, %v111_v1  ;;  %v293_v30 = vadd.f32 %v292_v19, %v120_v8 }
  0x34   :  { %v233_v27 = vrot.slane %v232_v16, 2  ;;  %v253_v28 = vrot.slane %v252_v17, 4  ;;  %v273_v29 = vadd.f32 %v272_v18, %v112_v7  ;;  %v283_v36 = vadd.f32 %v282_v25, %v121_v15 }
  0x35   :  { %v223_v33 = vadd.f32 %v222_v22, %v221_v9  ;;  %v243_v34 = vadd.f32 %v242_v23, %v241_v11  ;;  %v263_v35 = vadd.f32 %v262_v24, %v113_v14  ;;  %v294_v43 = vadd.f32 %v293_v30, %v122_v21 }
  0x36   :  { %v234_v40 = vadd.f32 %v233_v27, %v232_v16  ;;  %v254_v41 = vadd.f32 %v253_v28, %v252_v17  ;;  %v274_v42 = vadd.f32 %v273_v29, %v114_v20  ;;  %v284_v49 = vadd.f32 %v283_v36, %v123_v26 }
  0x37   :  { %v224_v45 = vrot.slane %v223_v33, 1  ;;  %v244_v46 = vrot.slane %v243_v34, 2  ;;  %v264_v47 = vrot.slane %v263_v35, 4  ;;  %v214_v50 = vadd.f32 %v213_v61, %v445_v39 }
  0x38   :  { %v255_v51 = vrot.slane %v254_v41, 2  ;;  %v275_v52 = vrot.slane %v274_v42, 4  ;;  %v295_v54 = vadd.f32 %v294_v43, %v124_v32  ;;  %v235_v55 = vrot.slane %v234_v40, 1 }
  0x39   :  { %v245_v56 = vadd.f32 %v244_v46, %v243_v34  ;;  %v265_v57 = vadd.f32 %v264_v47, %v263_v35  ;;  %v285_v58 = vadd.f32 %v284_v49, %v125_v37  ;;  %v225_v59 = vadd.f32 %v224_v45, %v223_v33 }
  0x3a   :  { %v256_v62 = vadd.f32 %v255_v51, %v254_v41  ;;  %v276_v63 = vadd.f32 %v275_v52, %v274_v42  ;;  %v296_v0 = vadd.f32 %v295_v54, %v126_v44  ;;  %v320_v5 = vsel %vm319_vm0, %v439_v10, %v435_v48 }
  0x3b   :  { %v246_v1 = vrot.slane %v245_v56, 1  ;;  %v266_v2 = vrot.slane %v265_v57, 2  ;;  %v286_v4 = vrot.slane %v285_v58, 4  ;;  %v322_v7 = vsel %vm321_vm1, %v443_v38, %v320_v5 }
  0x3c   :  { %v257_v6 = vrot.slane %v256_v62, 1  ;;  %v277_v39 = vrot.slane %v276_v63, 2  ;;  %v297_v61 = vrot.slane %v296_v0, 4  ;;  %v324_v12 = vsel %vm323_vm2, %v450_v3, %v322_v7 }
  0x3d   :  { %v247_v8 = vadd.f32 %v246_v1, %v245_v56  ;;  %v267_v9 = vadd.f32 %v266_v2, %v265_v57  ;;  %v287_v11 = vadd.f32 %v286_v4, %v285_v58  ;;  %v236_v13 = vadd.f32 %v235_v55, %v234_v40 }
  0x3e   :  { %v278_v14 = vadd.f32 %v277_v39, %v276_v63  ;;  %v298_v15 = vadd.f32 %v297_v61, %v296_v0  ;;  %v326_v16 = vsel %vm325_vm3, %v225_v59, %v324_v12  ;;  %v258_v17 = vadd.f32 %v257_v6, %v256_v62 }
  0x3f   :  { %v268_v18 = vrot.slane %v267_v9, 1  ;;  %v288_v48 = vrot.slane %v287_v11, 2  ;;  %v333_v10 = vsel %vm319_vm0, %v441_v31, %v437_v60  ;;  %v328_v22 = vsel %vm327_vm4, %v247_v8, %v326_v16 }
  0x40   :  { %v279_v19 = vrot.slane %v278_v14, 1  ;;  %v299_v38 = vrot.slane %v298_v15, 2  ;;  %v334_v20 = vsel %vm321_vm1, %v447_v53, %v333_v10 }
  0x41   :  { %v269_v21 = vadd.f32 %v268_v18, %v267_v9  ;;  %v289_v3 = vadd.f32 %v288_v48, %v287_v11  ;;  %v335_v23 = vsel %vm323_vm2, %v214_v50, %v334_v20 }
  0x42   :  { %v280_v24 = vadd.f32 %v279_v19, %v278_v14  ;;  %v300_v25 = vadd.f32 %v299_v38, %v298_v15  ;;  %v336_v26 = vsel %vm325_vm3, %v236_v13, %v335_v23 }
  0x43   :  { %v290_v27 = vrot.slane %v289_v3, 1  ;;  %v337_v28 = vsel %vm327_vm4, %v258_v17, %v336_v26  ;;  %v330_v31 = vsel %vm329_vm5, %v269_v21, %v328_v22 }
  0x44   :  { %v301_v60 = vrot.slane %v300_v25, 1  ;;  %v338_v30 = vsel %vm329_vm5, %v280_v24, %v337_v28 }
  0x45   :  { %v291_v29 = vadd.f32 %v290_v27, %v289_v3 }
  0x46   :  { %v302_v32 = vadd.f32 %v301_v60, %v300_v25 }
  0x47   :  { %v332_v53 = vsel %vm331_vm6, %v291_v29, %v330_v31 }
  0x48   :  { %v339_v33 = vsel %vm331_vm6, %v302_v32, %v338_v30  ;;  %v351_v34 = vmul.f32 0.020833334, %v332_v53 }
  0x49   :  { %v352_v35 = vmul.f32 0.020833334, %v339_v33 }
  0x4a   :  { %353 = vst [vmem:[#allocation6] sm:$0xff] %v351_v34 }
  0x4b   :  { %354 = vst [vmem:[#allocation6 + $0x8] sm:$0xff] %v352_v35 }
  0x4c   :  { %405 = shalt.err (!%p402_p9)
}
  0x4d   :  { %364 = dma.vmem_to_hbm [thread:$0]  %s362_s13, 256, %s474_s1, [#allocation5]  }
  0x4e   :  { %416 = dma.done.wait [#allocation5], 256  }
  0x4f   :  { %417 = vsyncadd [#allocation5], 4294967040 }
  0x50   :  { %368 = vsyncpa [#allocation4], 1 }
  0x51   :  { %369 = vsyncpa [#allocation5], 1 }

</bundles_post_ra>
